<compile_context>
chip_gen: v6e
topology: v6e:2x2x1
jax: 0.10.0
libtpu: 0.0.40
codegen_flags: <defaults>
</compile_context>

<pallas_src>
import functools

import numpy as np
import jax
import jax.numpy as jnp
from jax import lax
from jax.experimental import pallas as pl
from jax.experimental.pallas import tpu as pltpu


# ----------------------------------------------------------------------------
# Spatial operator construction (host-side, hoisted & cached)
# ----------------------------------------------------------------------------
def adaptive_pool_matrix(out_size: int, in_size: int) -> np.ndarray:
    """Row-stochastic P (out_size, in_size): P @ v == AdaptiveAvgPool1d(v)."""
    P = np.zeros((out_size, in_size), dtype=np.float32)
    for i in range(out_size):
        start = (i * in_size) // out_size
        end = -(-((i + 1) * in_size) // out_size)  # ceil
        P[i, start:end] = 1.0 / float(end - start)
    return P


def bilinear_upsample_matrix(out_size: int, in_size: int) -> np.ndarray:
    """U (out_size, in_size): U @ v == F.interpolate(v, mode='bilinear', align_corners=True)."""
    U = np.zeros((out_size, in_size), dtype=np.float32)
    if in_size == 1:
        U[:, 0] = 1.0
        return U
    for y in range(out_size):
        src = y * (in_size - 1) / (out_size - 1) if out_size > 1 else 0.0
        y0 = int(np.floor(src))
        y1 = min(y0 + 1, in_size - 1)
        w1 = src - y0
        U[y, y0] += 1.0 - w1
        U[y, y1] += w1
    return U


@functools.lru_cache(maxsize=None)
def _build_spatial_operators(H: int, W: int, bins: tuple, HWp: int):
    """Concatenated pool / upsample operators, zero-padded to HWp (lane-dense)."""
    HW = H * W
    a_rows, b_rows, offs, b2s = [], [], [], []
    off = 0
    for bn in bins:
        ph = adaptive_pool_matrix(bn, H)
        pw = adaptive_pool_matrix(bn, W)
        uh = bilinear_upsample_matrix(H, bn)
        uw = bilinear_upsample_matrix(W, bn)
        a_rows.append(np.kron(ph, pw))        # (bn*bn, HW)  pool operator
        b_rows.append(np.kron(uh, uw).T)      # (bn*bn, HW)  upsample operator
        offs.append(off)
        b2s.append(bn * bn)
        off += bn * bn
    a_cat = np.concatenate(a_rows, axis=0).astype(np.float32)   # (B2T, HW)
    b_cat = np.concatenate(b_rows, axis=0).astype(np.float32)   # (B2T, HW)
    if HWp != HW:
        pad = ((0, 0), (0, HWp - HW))
        a_cat = np.pad(a_cat, pad)
        b_cat = np.pad(b_cat, pad)
    return a_cat, b_cat, tuple(offs), tuple(b2s)


# ----------------------------------------------------------------------------
# Fused Pallas kernel: all pyramid branches + pass-through concat, one call
# ----------------------------------------------------------------------------
def _ppm_fused_kernel(x_ref, a_ref, w_ref, bias_ref, b_ref, o_ref):
    # x_ref:    (1, C, HWp)      one batch element, lane-dense flattened spatial
    # a_ref:    (B2T, HWp)       concatenated adaptive-avg-pool operators
    # w_ref:    (nb*R, C)        stacked 1x1 conv weights, BN scale folded in
    # bias_ref: (nb*R, B2T)      folded BN bias on block-diagonal, -1e30 off-block
    # b_ref:    (B2T, HWp)       concatenated bilinear (align_corners) upsample ops
    # o_ref:    (1, C + nb*R, HWp)
    x = x_ref[0]                                  # (C, HWp) f32
    cdt = a_ref.dtype                             # matmul compute dtype (f32 or bf16)

    # pooled[c, k] = sum_s x[c, s] * A_cat[k, s]   (contract on lane-dense HW axis)
    pooled = lax.dot_general(
        x.astype(cdt), a_ref[...],
        dimension_numbers=(((1,), (1,)), ((), ())),
        preferred_element_type=jnp.float32)       # (C, B2T)

    conv = jnp.dot(w_ref[...], pooled.astype(cdt),
                   preferred_element_type=jnp.float32)   # (nb*R, B2T)

    # BN bias + ReLU; off-block bias = -1e30 kills cross-branch terms.
    act = jnp.maximum(conv + bias_ref[...], 0.0)         # (nb*R, B2T)

    up = jnp.dot(act.astype(cdt), b_ref[...],
                 preferred_element_type=jnp.float32)     # (nb*R, HWp)

    C = x.shape[0]
    o_ref[0, :C, :] = x.astype(o_ref.dtype)              # pass-through channels
    o_ref[0, C:, :] = up.astype(o_ref.dtype)             # branch channels


# ----------------------------------------------------------------------------
# Parameters & forward
# ----------------------------------------------------------------------------
def init_ppm_params(key, in_dim, reduction_dim, bins):
    params = []
    for _ in bins:
        key, kw, kg, kb = jax.random.split(key, 4)
        params.append(dict(
            w=jax.random.normal(kw, (reduction_dim, in_dim), jnp.float32) * 0.1,
            gamma=jax.random.normal(kg, (reduction_dim,), jnp.float32) * 0.1 + 1.0,
            beta=jax.random.normal(kb, (reduction_dim,), jnp.float32) * 0.1,
            mean=jnp.zeros((reduction_dim,), jnp.float32),
            var=jnp.ones((reduction_dim,), jnp.float32),
        ))
    return params


def make_ppm_apply(params, bins, H, W, eps=1e-5, matmul_dtype=jnp.float32):
    """Fold BN, build fused operators once, and return a jitted forward fn."""
    bins = tuple(bins)
    nb = len(bins)
    R, C = params[0]['w'].shape
    HW = H * W
    HWp = ((HW + 127) // 128) * 128               # lane-dense output/operand last dim

    a_cat_np, b_cat_np, col_off, b2s = _build_spatial_operators(H, W, bins, HWp)
    B2T = a_cat_np.shape[0]

    NEG = -1e30
    w_stack_np = np.zeros((nb * R, C), dtype=np.float32)
    bias_full_np = np.full((nb * R, B2T), NEG, dtype=np.float32)
    for bi, p in enumerate(params):
        scale = np.asarray(p['gamma']) / np.sqrt(np.asarray(p['var']) + eps)
        bias = np.asarray(p['beta']) - np.asarray(p['mean']) * scale
        w_stack_np[bi * R:(bi + 1) * R, :] = scale[:, None] * np.asarray(p['w'])
        bias_full_np[bi * R:(bi + 1) * R,
                     col_off[bi]:col_off[bi] + b2s[bi]] = bias[:, None]

    a_cat = jnp.asarray(a_cat_np, dtype=matmul_dtype)        # (B2T, HWp)
    b_cat = jnp.asarray(b_cat_np, dtype=matmul_dtype)        # (B2T, HWp)
    w_stack = jnp.asarray(w_stack_np, dtype=matmul_dtype)    # (nb*R, C)
    bias_full = jnp.asarray(bias_full_np, dtype=jnp.float32) # (nb*R, B2T)

    out_ch = C + nb * R

    @jax.jit
    def apply(x):
        N = x.shape[0]
        x_flat = x.reshape(N, C, HW).astype(jnp.float32)
        if HWp != HW:
            x_flat = jnp.pad(x_flat, ((0, 0), (0, 0), (0, HWp - HW)))
        out = pl.pallas_call(
            _ppm_fused_kernel,
            out_shape=jax.ShapeDtypeStruct((N, out_ch, HWp), jnp.float32),
            grid=(N,),
            in_specs=[
                pl.BlockSpec((1, C, HWp), lambda n: (n, 0, 0)),
                pl.BlockSpec((B2T, HWp), lambda n: (0, 0)),
                pl.BlockSpec((nb * R, C), lambda n: (0, 0)),
                pl.BlockSpec((nb * R, B2T), lambda n: (0, 0)),
                pl.BlockSpec((B2T, HWp), lambda n: (0, 0)),
            ],
            out_specs=pl.BlockSpec((1, out_ch, HWp), lambda n: (n, 0, 0)),
            compiler_params=pltpu.CompilerParams(
                dimension_semantics=("parallel",)),
        )(x_flat, a_cat, w_stack, bias_full, b_cat)
        if HWp != HW:
            out = out[:, :, :HW]
        return out.reshape(N, out_ch, H, W)

    return apply


# ----------------------------------------------------------------------------
# Pure-JAX f32 reference of the same math (validates the Pallas kernel)
# ----------------------------------------------------------------------------
def ppm_reference(x, params, bins, eps=1e-5):
    N, C, H, W = x.shape
    x_flat = x.reshape(N, C, H * W).astype(jnp.float32)
    outs = [x]
    for bin_size, p in zip(bins, params):
        a_t = jnp.asarray(np.kron(adaptive_pool_matrix(bin_size, H),
                                  adaptive_pool_matrix(bin_size, W)).T)
        b_t = jnp.asarray(np.kron(bilinear_upsample_matrix(H, bin_size),
                                  bilinear_upsample_matrix(W, bin_size)).T)
        scale = p['gamma'] / jnp.sqrt(p['var'] + eps)
        bias = p['beta'] - p['mean'] * scale
        pooled = jnp.einsum('ncs,sb->ncb', x_flat, a_t)
        conv = jnp.einsum('rc,ncb->nrb', p['w'], pooled)
        act = jnp.maximum(conv * scale[None, :, None] + bias[None, :, None], 0.0)
        up = jnp.einsum('nrb,bs->nrs', act, b_t)
        outs.append(up.reshape(N, -1, H, W))
    return jnp.concatenate(outs, axis=1)


if __name__ == "__main__":
    key = jax.random.PRNGKey(0)
    kx, kp = jax.random.split(key)

    N, C, H, W = 2, 4, 16, 16
    bins = (1, 2, 3, 6)          # classic PSPNet bins (includes non-divisible sizes)
    reduction_dim = 2

    x = jax.random.normal(kx, (N, C, H, W), jnp.float32)
    params = init_ppm_params(kp, C, reduction_dim, bins)

    ppm = make_ppm_apply(params, bins, H, W)      # operators built & baked once
    out = jax.block_until_ready(ppm(x))

    ref = ppm_reference(x, params, bins)
    assert out.shape == (N, C + reduction_dim * len(bins), H, W)
    assert np.allclose(np.asarray(out), np.asarray(ref), atol=1e-4, rtol=1e-4)

    print("KERNEL_OK")
</pallas_src>

<mosaic_0001>
module attributes {stable_mosaic.version = 11 : i64} {
  func.func @_ppm_fused_kernel(%arg0: i32, %arg1: memref<1x4x256xf32, #tpu.memory_space<vmem>>, %arg2: memref<50x256xf32, #tpu.memory_space<vmem>>, %arg3: memref<8x4xf32, #tpu.memory_space<vmem>>, %arg4: memref<8x50xf32, #tpu.memory_space<vmem>>, %arg5: memref<50x256xf32, #tpu.memory_space<vmem>>, %arg6: memref<1x12x256xf32, #tpu.memory_space<vmem>>) attributes {dimension_semantics = [#tpu.dimension_semantics<parallel>], iteration_bounds = array<i64: 2>, scalar_prefetch = 0 : i64, scratch_operands = 0 : i64, tpu.core_type = #tpu.core_type<tc>, window_params = [{transform_indices = @transform_0, window_bounds = array<i64: 1, 4, 256>}, {pipeline_mode = #tpu.pipeline_mode<synchronous>, transform_indices = @transform_1, window_bounds = array<i64: 50, 256>}, {pipeline_mode = #tpu.pipeline_mode<synchronous>, transform_indices = @transform_2, window_bounds = array<i64: 8, 4>}, {pipeline_mode = #tpu.pipeline_mode<synchronous>, transform_indices = @transform_3, window_bounds = array<i64: 8, 50>}, {pipeline_mode = #tpu.pipeline_mode<synchronous>, transform_indices = @transform_4, window_bounds = array<i64: 50, 256>}, {transform_indices = @transform_5, window_bounds = array<i64: 1, 12, 256>}]} {
    %c0 = arith.constant 0 : index
    %c0_0 = arith.constant 0 : index
    %c0_1 = arith.constant 0 : index
    %0 = vector.load %arg1[%c0, %c0_0, %c0_1] : memref<1x4x256xf32, #tpu.memory_space<vmem>>, vector<1x4x256xf32>
    %1 = vector.shape_cast %0 : vector<1x4x256xf32> to vector<4x256xf32>
    %c0_2 = arith.constant 0 : index
    %c0_3 = arith.constant 0 : index
    %2 = vector.load %arg2[%c0_2, %c0_3] : memref<50x256xf32, #tpu.memory_space<vmem>>, vector<50x256xf32>
    %cst = arith.constant dense<0.000000e+00> : vector<4x50xf32>
    %3 = tpu.matmul %1, %2, %cst {dimension_numbers = #tpu.dot_dimension_numbers<[1], [1], [0], [0], [0, 0, 1, 0], [], []>} : vector<4x256xf32>, vector<50x256xf32>, vector<4x50xf32> -> vector<4x50xf32>
    %c0_4 = arith.constant 0 : index
    %c0_5 = arith.constant 0 : index
    %4 = vector.load %arg3[%c0_4, %c0_5] : memref<8x4xf32, #tpu.memory_space<vmem>>, vector<8x4xf32>
    %cst_6 = arith.constant dense<0.000000e+00> : vector<8x50xf32>
    %5 = tpu.matmul %4, %3, %cst_6 {dimension_numbers = #tpu.dot_dimension_numbers<[1], [0], [0], [1], [0, 0, 1, 1], [], []>} : vector<8x4xf32>, vector<4x50xf32>, vector<8x50xf32> -> vector<8x50xf32>
    %c0_7 = arith.constant 0 : index
    %c0_8 = arith.constant 0 : index
    %6 = vector.load %arg4[%c0_7, %c0_8] : memref<8x50xf32, #tpu.memory_space<vmem>>, vector<8x50xf32>
    %7 = arith.addf %5, %6 : vector<8x50xf32>
    %cst_9 = arith.constant 0.000000e+00 : f32
    %8 = vector.broadcast %cst_9 : f32 to vector<8x50xf32>
    %9 = arith.maximumf %7, %8 : vector<8x50xf32>
    %c0_10 = arith.constant 0 : index
    %c0_11 = arith.constant 0 : index
    %10 = vector.load %arg5[%c0_10, %c0_11] : memref<50x256xf32, #tpu.memory_space<vmem>>, vector<50x256xf32>
    %cst_12 = arith.constant dense<0.000000e+00> : vector<8x256xf32>
    %11 = tpu.matmul %9, %10, %cst_12 {dimension_numbers = #tpu.dot_dimension_numbers<[1], [0], [0], [1], [0, 0, 1, 1], [], []>} : vector<8x50xf32>, vector<50x256xf32>, vector<8x256xf32> -> vector<8x256xf32>
    %c0_13 = arith.constant 0 : index
    %c0_14 = arith.constant 0 : index
    %c0_15 = arith.constant 0 : index
    %12 = vector.load %arg6[%c0_13, %c0_14, %c0_15] : memref<1x12x256xf32, #tpu.memory_space<vmem>>, vector<1x4x256xf32>
    %13 = vector.shape_cast %12 : vector<1x4x256xf32> to vector<4x256xf32>
    %14 = vector.shape_cast %1 : vector<4x256xf32> to vector<1x4x256xf32>
    tpu.vector_store %arg6[%c0_13, %c0_14, %c0_15], %14 {strides = array<i32>} : memref<1x12x256xf32, #tpu.memory_space<vmem>>, vector<1x4x256xf32>,
    %c0_16 = arith.constant 0 : index
    %c4 = arith.constant 4 : index
    %c0_17 = arith.constant 0 : index
    %15 = vector.load %arg6[%c0_16, %c4, %c0_17] : memref<1x12x256xf32, #tpu.memory_space<vmem>>, vector<1x8x256xf32>
    %16 = vector.shape_cast %15 : vector<1x8x256xf32> to vector<8x256xf32>
    %17 = vector.shape_cast %11 : vector<8x256xf32> to vector<1x8x256xf32>
    tpu.vector_store %arg6[%c0_16, %c4, %c0_17], %17 {strides = array<i32>} : memref<1x12x256xf32, #tpu.memory_space<vmem>>, vector<1x8x256xf32>,
    return
  }
  func.func @transform_0(%arg0: i32) -> (i32, i32, i32) {
    %c0_i32 = arith.constant 0 : i32
    %c0_i32_0 = arith.constant 0 : i32
    %c0_i32_1 = arith.constant 0 : i32
    return %arg0, %c0_i32, %c0_i32_0 : i32, i32, i32
  }
  func.func @transform_1(%arg0: i32) -> (i32, i32) {
    %c0_i32 = arith.constant 0 : i32
    %c0_i32_0 = arith.constant 0 : i32
    %c0_i32_1 = arith.constant 0 : i32
    return %c0_i32, %c0_i32_0 : i32, i32
  }
  func.func @transform_2(%arg0: i32) -> (i32, i32) {
    %c0_i32 = arith.constant 0 : i32
    %c0_i32_0 = arith.constant 0 : i32
    %c0_i32_1 = arith.constant 0 : i32
    return %c0_i32, %c0_i32_0 : i32, i32
  }
  func.func @transform_3(%arg0: i32) -> (i32, i32) {
    %c0_i32 = arith.constant 0 : i32
    %c0_i32_0 = arith.constant 0 : i32
    %c0_i32_1 = arith.constant 0 : i32
    return %c0_i32, %c0_i32_0 : i32, i32
  }
  func.func @transform_4(%arg0: i32) -> (i32, i32) {
    %c0_i32 = arith.constant 0 : i32
    %c0_i32_0 = arith.constant 0 : i32
    %c0_i32_1 = arith.constant 0 : i32
    return %c0_i32, %c0_i32_0 : i32, i32
  }
  func.func @transform_5(%arg0: i32) -> (i32, i32, i32) {
    %c0_i32 = arith.constant 0 : i32
    %c0_i32_0 = arith.constant 0 : i32
    %c0_i32_1 = arith.constant 0 : i32
    return %arg0, %c0_i32, %c0_i32_0 : i32, i32, i32
  }
}

</mosaic_0001>

<bundles_post_ra>
// kernel: apply.1
= control target key start
LH: loop header
LB: loop body
LE: loop exit
PB: predicated region body
PF: predicated region fallthrough
CT: control target
= control target key end

     0   :  { %10 = vsyncpa [#allocation3], 0  ;;  %s708_s18 = smov 0   ;;  %s793_s0 = inlined_call_operand.vmem [shape: f32[2,4,256], index: 0, kind: input, shape index: {}]   ;;  %s794_s1 = inlined_call_operand.hbm [shape: f32[50,256], index: 1, kind: input, shape index: {}]   ;;  %s795_s2 = inlined_call_operand.vmem [shape: f32[8,4], index: 2, kind: input, shape index: {}]   ;;  %s796_s3 = inlined_call_operand.vmem [shape: f32[8,50], index: 3, kind: input, shape index: {}]   ;;  %s797_s4 = inlined_call_operand.vmem [shape: f32[50,256], index: 4, kind: input, shape index: {}]   ;;  %s798_s5 = inlined_call_operand.vmem [shape: f32[2,12,256], index: 5, kind: output, shape index: {}]  }
   0x1 LB: > { %s584_s19 = sadd.s32 4294967295, %s671_s18   ;;  %p586_p0 = scmp.ge.s32.totalorder %s671_s18, 1  ;;  %s671_s18 = sphi %s708_s18, %s16_s18  }
   0x2   : > { %p157_p1 = scmp.lt.s32.totalorder %s671_s18, 3  ;;  %s673_s20 = smov [#allocation2]  }
   0x3   : > { %s169_s21 = sshll.u32 %s673_s20, 4  ;;  %p619_p3 = scmp.eq.s32.totalorder %s584_s19, 0  ;;  %s170_s21 = int_to_ptr.vmem [resolvable:$true] %s169_s21 }
   0x4   : > { %p716_p2 = pnand %p586_p0, %p157_p1  ;;  %s646_s23 = scalar_lea.vmem %s170_s21, 1792 }
   0x5   : > { %p647_p7 = scmp.ne.s32.totalorder %s170_s21, %s646_s23  ;;  %p654_p10 = scmp.lt.s32.totalorder %s170_s21, %s170_s21 }
   0x6   : > { %p615_p4 = pneg %p716_p2  ;;  %p655_p11 = scmp.lt.s32.totalorder %s646_s23, %s646_s23 }
   0x8   : > { %p616_p5 = pnand %p619_p3, %p615_p4  ;;  %p656_p12 = por %p655_p11, %p654_p10 }
   0xa   : > { %p637_p6 = pneg %p616_p5 }
   0xc   : > { %p649_p8 = pnand %p647_p7, %p637_p6 }
   0xe   : > { %p650_p9 = pneg %p649_p8 }
  0x10   : > { %p657_p13 = pnand %p656_p12, %p650_p9 }
  0x12   : > { %660 = shalt.err (!%p657_p13)
}
  0x13   : > { %s674_s24 = smov 256   ;;  %s675_s25 = smov 16  }
  0x14   : > { %618 = dma.hbm_to_vmem [thread:$0]  (!%p616_p5), %s794_s1, 1792, %s170_s21, [#allocation3], %s674_s24, %s674_s24, %s675_s25  }
  0x15   : > { %202 = sbr.rel (%p716_p2) target bundleno = 645 (0x285), region = 40 }
  0x1a   : > { %666 = dma.done.wait (%p619_p3), [#allocation3], 1792  }
  0x1b   : > { %668 = vsyncadd (%p619_p3), [#allocation3], 4294965504  ;;  %p230_p0 = scmp.lt.s32.totalorder %s584_s19, 1  ;;  %v254_v0 = vld [vmem:[#allocation2 + $0x68] sm:$0x3]  ;;  %v252_v2 = vld [vmem:[#allocation2 + $0x58] sm:$0xff] }
  0x1c   : > { %v253_v1 = vld [vmem:[#allocation2 + $0x60] sm:$0x3]  ;;  %276 = vmatprep.subr.mxu0 %v254_v0  ;;  %v251_v3 = vld [vmem:[#allocation2 + $0x50] sm:$0xff]  ;;  %v250_v4 = vld [vmem:[#allocation2 + $0x48] sm:$0xff]  ;;  %v676_v16 = vmov 0.0   ;;  %vm677_vm0 = vmmov 0  }
  0x1d   : > { %s801_s19 = smov (!%p230_p0, %s584_s19), 1  ;;  %277 = vmatpush1.xpose.msra.mxu0 %v253_v1  ;;  %v249_v7 = vld [vmem:[#allocation2 + $0x40] sm:$0xff]  ;;  %v248_v8 = vld [vmem:[#allocation2 + $0x38] sm:$0xff]  ;;  %v247_v9 = vld [vmem:[#allocation2 + $0x30] sm:$0xff]  ;;  %606 = vmatprep.subr.mxu1 %v676_v16  ;;  %vm334_vm1 = vcmask 1043456   ;;  %vm330_vm2 = vcmask 31744  }
  0x1e   : > { %s602_s28 = sshll.u32 %s801_s19, 3  ;;  %s603_s7 = sshll.u32 %s801_s19, 5  ;;  %278 = vmatprep.subr.mxu0 %v252_v2  ;;  %v246_v10 = vld [vmem:[#allocation2 + $0x28] sm:$0xff]  ;;  %v245_v11 = vld [vmem:[#allocation2 + $0x20] sm:$0xff]  ;;  %v244_v12 = vld [vmem:[#allocation2 + $0x18] sm:$0xff]  ;;  %608 = vmatprep.mubr.msk.f32.mxu1 %vm677_vm0, %v676_v16  ;;  %vm427_vm3 = vcmask 1041408  }
  0x1f   : > { %s234_s6 = scalar_lea.vmem %s793_s0, %s602_s28  ;;  %s736_s10 = scalar_lea.vmem %s798_s5, %s603_s7  ;;  %v243_v13 = vld [vmem:[#allocation2 + $0x10] sm:$0xff]  ;;  %v242_v14 = vld [vmem:[#allocation2 + $0x8] sm:$0xff]  ;;  %v241_v15 = vld [vmem:[#allocation2] sm:$0xff]  ;;  %vm423_vm4 = vcmask 408576  }
  0x20   : > { %v240_v5 = vld [vmem:[%s234_s6] sm:$0xff]  ;;  %v422_v18 = vld [vmem:[%s797_s4 + $0x68] sm:$0x3]  ;;  %v420_v21 = vld [vmem:[%s797_s4 + $0x58] sm:$0xff] }
  0x21   : > { %v256_v6 = vcombine.high %v240_v5, %v240_v5  ;;  %505 = vst [vmem:[%s736_s10] sm:$0xf] %v240_v5  ;;  %279 = vmatpush1.xpose.msra.mxu0 %v251_v3  ;;  %v328_v17 = vld [vmem:[%s795_s2] sm:$0xff]  ;;  %v419_v23 = vld [vmem:[%s797_s4 + $0x50] sm:$0xff]  ;;  %v418_v24 = vld [vmem:[%s797_s4 + $0x48] sm:$0xff] }
  0x22   : > { %280 = vmatprep.subr.mxu0 %v250_v4  ;;  %v421_v20 = vld [vmem:[%s797_s4 + $0x60] sm:$0x3]  ;;  %v416_v26 = vld [vmem:[%s797_s4 + $0x38] sm:$0xff]  ;;  %v415_v27 = vld [vmem:[%s797_s4 + $0x30] sm:$0xff] }
  0x23   : > { %322 = vmatprep.mubr.f32.mxu0 %v256_v6  ;;  %506 = vst [vmem:[%s736_s10 + $0x8] sm:$0xf] %v256_v6  ;;  %v417_v25 = vld [vmem:[%s797_s4 + $0x40] sm:$0xff]  ;;  %v414_v28 = vld [vmem:[%s797_s4 + $0x28] sm:$0xff]  ;;  %v412_v30 = vld [vmem:[%s797_s4 + $0x18] sm:$0xff] }
  0x24   : > { %v413_v29 = vld [vmem:[%s797_s4 + $0x20] sm:$0xff]  ;;  %v411_v31 = vld [vmem:[%s797_s4 + $0x10] sm:$0xff]  ;;  %v410_v32 = vld [vmem:[%s797_s4 + $0x8] sm:$0xff] }
  0x25   : > { %281 = vmatpush1.xpose.msra.mxu0 %v249_v7  ;;  %v409_v33 = vld [vmem:[%s797_s4] sm:$0xff] }
  0x26   : > { %282 = vmatprep.subr.mxu0 %v248_v8  ;;  %v329_v34 = vld [vmem:[%s796_s3] sm:$0xff] }
  0x29   : > { %283 = vmatpush1.xpose.msra.mxu0 %v247_v9 }
  0x2a   : > { %284 = vmatprep.subr.mxu0 %v246_v10 }
  0x2d   : > { %285 = vmatpush1.xpose.msra.mxu0 %v245_v11 }
  0x2e   : > { %286 = vmatprep.subr.mxu0 %v244_v12 }
  0x31   : > { %287 = vmatpush1.xpose.msra.mxu0 %v243_v13 }
  0x32   : > { %288 = vmatprep.subr.mxu0 %v242_v14 }
  0x35   : > { %289 = vmatpush1.xpose.msra.mxu0 %v241_v15 }
  0x38   : > { %323 = vmatmul.mubr.f32.vlgmr.msra.gmra.mxu0 %v240_v5 }
  0xf8   : > { %v324_v19 = vpop.f32.mrf.mxu0 }
  0xf9   : > { %607 = vmatpush3.msk.msra.mxu1 %vm334_vm1, %v324_v19 }
  0xfa   : > { %v326_v22 = vpop.f32.mrf.mxu0  ;;  %609 = vmatmul.mubr.msk.f32.vlgmr.msra.gmra.mxu1 %vm330_vm2, %v328_v17  ;;  %597 = vmatprep.subr.msk.mxu1 %vm427_vm3, %v422_v18 }
  0xfb   : > { %598 = vmatpush1.msk.msra.mxu1 %vm427_vm3, %v421_v20  ;;  %498 = vmatprep.mubr.f32.mxu1 %v676_v16 }
  0xfc   : > { %454 = vmatprep.subr.mxu1 %v420_v21 }
  0xfd   : > { %455 = vmatpush1.msra.mxu1 %v419_v23 }
  0xfe   : > { %456 = vmatprep.subr.mxu1 %v418_v24 }
  0xff   : > { %457 = vmatpush1.msra.mxu1 %v417_v25 }
 0x100   : > { %458 = vmatprep.subr.mxu1 %v416_v26 }
 0x101   : > { %459 = vmatpush1.msra.mxu1 %v415_v27 }
 0x102   : > { %460 = vmatprep.subr.mxu1 %v414_v28 }
 0x103   : > { %461 = vmatpush1.msra.mxu1 %v413_v29 }
 0x104   : > { %462 = vmatprep.subr.mxu1 %v412_v30 }
 0x105   : > { %463 = vmatpush1.msra.mxu1 %v411_v31 }
 0x106   : > { %464 = vmatprep.subr.mxu1 %v410_v32 }
 0x107   : > { %465 = vmatpush1.msra.mxu1 %v409_v33 }
 0x1ba   : > { %v404_v35 = vpop.f32.mrf.mxu1 }
 0x1bb   : > { %v405_v36 = vadd.f32 %v404_v35, %v329_v34 }
 0x1bc   : > { %v610_v37 = vpop.f32.mrf.mxu1 }
 0x1bd   : > { %v408_v38 = vmax.f32 %v405_v36, 0.0 }
 0x1bf   : > { %599 = vmatmul.mubr.msk.f32.vlgmr.msra.gmra.mxu1 %vm423_vm4, %v408_v38 }
 0x27f   : > { %v500_v39 = vpop.f32.mrf.mxu1 }
 0x280   : > { %v509_v40 = vrot.slane %v500_v39, 4 }
 0x281   : > { %v502_v41 = vpop.f32.mrf.mxu1 }
 0x282   : > { %513 = vst [vmem:[%s736_s10 + $0x10] ss:$-12 sps:$4 sm:$0xff] %v509_v40   ;;  %v510_v42 = vrot.slane %v502_v41, 4 }
 0x284   : > { %514 = vst [vmem:[%s736_s10 + $0x18] ss:$-12 sps:$4 sm:$0xff] %v510_v42  }
 0x285 PF: > { %s16_s18 = sadd.s32 1, %s671_s18  }
 0x286   : > { %p13_p1 = scmp.ge.s32.totalorder %s16_s18, 4  }
 0x288   :  { %15 = sbr.rel (!%p13_p1) target bundleno = 1 (0x1), region = 75 }
 0x28d   :  { %538 = vsyncpa [#allocation3], 1 }
 0x28e   :  { %540 = vsyncpa [#allocation3 + $0x1], 1 }

</bundles_post_ra>
